<compile_context>
chip_gen: v5e
topology: v5e:2x2
jax: 0.10.0
libtpu: 0.0.40
codegen_flags: <defaults>
</compile_context>

<pallas_src>
import math

import jax
import jax.numpy as jnp
from jax import lax
from jax.experimental import pallas as pl
from jax.experimental.pallas import tpu as pltpu


def _pick_batch_block(n):
    """Largest divisor of n that keeps >= 2 grid steps (v7x megacore) and a modest unroll."""
    if n <= 1:
        return 1
    cap = min(n // 2, 8)
    for nb in range(cap, 0, -1):
        if n % nb == 0:
            return nb
    return 1


def _padded_bytes(shape, dtype):
    """Rough VMEM footprint of a tile with (8, 128) sublane/lane padding."""
    shape = tuple(int(d) for d in shape)
    if len(shape) == 1:
        shape = (1,) + shape
    *lead, sub, lane = shape
    sub = pl.cdiv(sub, 8) * 8
    lane = pl.cdiv(lane, 128) * 128
    return math.prod(lead) * sub * lane * jnp.dtype(dtype).itemsize


def _make_conv_kernel(k, Wp, L, L_ext, C_in_p, C_out, NB, out_dtype):
    K = k * k * C_in_p

    def kernel(x_ref, w_ref, b_ref, o_ref):
        # x_ref: (NB, C_in_p, L_ext)  flattened, tail-extended, reflection-padded images
        # w_ref: (C_out, K)           flipped / flattened weights
        # b_ref: (C_out, 1)           float32 bias
        # o_ref: (NB, C_out, L)       dense stride-1 conv over the padded grid (lane-dense)
        w = w_ref[...]
        # Hoist the bias broadcast once per grid step (JAX does not CSE broadcast_in_dim).
        b = jnp.broadcast_to(b_ref[...], (C_out, L))
        for n in range(NB):                       # NB is a small static int (unrolled)
            x = x_ref[n]                          # (C_in_p, L_ext)
            # k*k lane-shifted copies (static lane slices ~ XLU rotations); no per-tap
            # strided (Hp, Wp) -> (H_out, W_out) repack.
            taps = [
                lax.slice(x, (0, i * Wp + j), (C_in_p, i * Wp + j + L))
                for i in range(k) for j in range(k)
            ]
            patches = jnp.concatenate(taps, axis=0)            # (K, L), tile-aligned concat
            acc = jnp.dot(w, patches,
                          preferred_element_type=jnp.float32)  # (C_out, L) f32 on the MXU
            o_ref[n] = (acc + b).astype(out_dtype)              # lane-dense store

    return kernel


def conv_layer_forward(x_nchw, weight, bias, kernel_size, stride,
                       compute_dtype=jnp.float32):
    """nn.Sequential(ReflectionPad2d(k//2), Conv2d(C_in, C_out, k, stride)) forward.

    Note: for even kernel_size, pad = k//2 followed by a VALID conv yields an output of
    (H - k + 2*(k//2))//s + 1 (e.g. H+1 for stride 1) -- this mirrors the PyTorch
    composition exactly; it is NOT a 'same' convolution.
    """
    k = int(kernel_size)
    s = int(stride)
    pad = k // 2
    N, C_in, H, W = map(int, x_nchw.shape)
    C_out = int(weight.shape[0])
    out_dtype = x_nchw.dtype

    Hp, Wp = H + 2 * pad, W + 2 * pad
    H_out = (Hp - k) // s + 1
    W_out = (Wp - k) // s + 1
    L = Hp * Wp                                   # dense (stride-1) output positions
    L_ext = L + (k - 1) * (Wp + 1)                # tail so every tap slice stays in-bounds
    C_in_p = pl.cdiv(C_in, 8) * 8                 # sublane-align channels (zero padded)
    K = k * k * C_in_p

    # ---- XLA glue: reflection pad (NCHW), channel zero-pad, flatten spatial onto lanes ----
    x_rp = jnp.pad(x_nchw, ((0, 0), (0, 0), (pad, pad), (pad, pad)), mode="reflect")
    if C_in_p != C_in:
        x_rp = jnp.pad(x_rp, ((0, 0), (0, C_in_p - C_in), (0, 0), (0, 0)))
    x_flat = x_rp.reshape(N, C_in_p, L).astype(compute_dtype)
    x_flat = jnp.pad(x_flat, ((0, 0), (0, 0), (0, L_ext - L)))

    # weight (O, I, kh, kw) -> (C_out, k*k*C_in_p); column index = (i*k + j)*C_in_p + c,
    # matching the tap-major / channel-minor row order of `patches` in the kernel.
    w_p = jnp.pad(weight, ((0, 0), (0, C_in_p - C_in), (0, 0), (0, 0)))
    w_mat = jnp.transpose(w_p, (0, 2, 3, 1)).reshape(C_out, K).astype(compute_dtype)
    b_col = bias.reshape(C_out, 1).astype(jnp.float32)

    NB = _pick_batch_block(N)
    grid = (N // NB,)

    kernel = _make_conv_kernel(k, Wp, L, L_ext, C_in_p, C_out, NB, out_dtype)

    # VMEM: double-buffered blocks + working set, with headroom (valid on v7x's 64 MiB too).
    vmem_need = (
        2 * _padded_bytes((NB, C_in_p, L_ext), compute_dtype)
        + 2 * _padded_bytes((C_out, K), compute_dtype)
        + 2 * _padded_bytes((C_out, 1), jnp.float32)
        + 2 * _padded_bytes((NB, C_out, L), out_dtype)
        + 2 * _padded_bytes((K, L), compute_dtype)        # taps + patches working set
        + 2 * _padded_bytes((C_out, L), jnp.float32)      # accumulator + bias broadcast
    )
    vmem_limit = int(min(max(4 * vmem_need, 4 * 1024 * 1024), 64 * 1024 * 1024))

    in_item = jnp.dtype(compute_dtype).itemsize
    out_item = jnp.dtype(out_dtype).itemsize
    cost = pl.CostEstimate(
        flops=int(2 * N * C_out * K * L),
        transcendentals=0,
        bytes_accessed=int(N * C_in_p * L_ext * in_item + C_out * K * in_item
                           + C_out * 4 + N * C_out * L * out_item),
    )

    out_flat = pl.pallas_call(
        kernel,
        out_shape=jax.ShapeDtypeStruct((N, C_out, L), out_dtype),
        grid_spec=pltpu.PrefetchScalarGridSpec(
            num_scalar_prefetch=0,
            grid=grid,
            in_specs=[
                pl.BlockSpec((NB, C_in_p, L_ext), lambda n: (n, 0, 0)),
                pl.BlockSpec((C_out, K), lambda n: (0, 0)),     # grid-invariant (no re-DMA)
                pl.BlockSpec((C_out, 1), lambda n: (0, 0)),     # grid-invariant (no re-DMA)
            ],
            out_specs=pl.BlockSpec((NB, C_out, L), lambda n: (n, 0, 0)),
        ),
        compiler_params=pltpu.CompilerParams(
            dimension_semantics=("parallel",),
            vmem_limit_bytes=vmem_limit,
        ),
        cost_estimate=cost,
    )(x_flat, w_mat, b_col)

    # Valid interior (and stride subsampling): one tiny XLA slice.  The kernel output is
    # already channel-major, so no transpose pass through HBM is needed.
    out = out_flat.reshape(N, C_out, Hp, Wp)
    out = lax.slice(out, (0, 0, 0, 0),
                    (N, C_out, (H_out - 1) * s + 1, (W_out - 1) * s + 1),
                    (1, 1, s, s))
    return out


if __name__ == "__main__":
    # Module hyperparameters (small, consistent with the ConvLayer forward)
    batch, in_channels, out_channels = 2, 4, 8
    kernel_size, stride = 3, 1
    H = W = 16

    key = jax.random.PRNGKey(0)
    kx, kw, kb = jax.random.split(key, 3)

    x = jax.random.normal(kx, (batch, in_channels, H, W), dtype=jnp.float32)
    fan_in = in_channels * kernel_size * kernel_size
    bound = 1.0 / math.sqrt(fan_in)
    weight = jax.random.uniform(
        kw, (out_channels, in_channels, kernel_size, kernel_size),
        minval=-bound, maxval=bound, dtype=jnp.float32)
    bias = jax.random.uniform(kb, (out_channels,), minval=-bound, maxval=bound,
                              dtype=jnp.float32)

    # Reference: full-precision XLA conv on the reflection-padded input.
    pad = kernel_size // 2
    x_ref_pad = jnp.pad(x, ((0, 0), (0, 0), (pad, pad), (pad, pad)), mode="reflect")
    ref = lax.conv_general_dilated(
        x_ref_pad, weight, window_strides=(stride, stride), padding="VALID",
        dimension_numbers=("NCHW", "OIHW", "NCHW"),
        precision=lax.Precision.HIGHEST,
    ) + bias[None, :, None, None]

    y = jax.block_until_ready(
        conv_layer_forward(x, weight, bias, kernel_size, stride))
    assert y.shape == ref.shape, (y.shape, ref.shape)
    # f32 operands on the MXU may be lowered through bf16 passes depending on backend
    # defaults (review correctness note), so the tolerance sits above that noise floor;
    # any indexing/layout bug would produce O(1) errors and still fail this check.
    err = float(jnp.max(jnp.abs(y - ref)))
    assert jnp.allclose(y, ref, atol=2e-2, rtol=2e-2), f"max abs err = {err}"

    print("KERNEL_OK")
</pallas_src>

<mosaic_0001>
module attributes {stable_mosaic.version = 11 : i64} {
  func.func @kernel(%arg0: i32, %arg1: memref<1x8x362xf32, #tpu.memory_space<vmem>>, %arg2: memref<8x72xf32, #tpu.memory_space<vmem>>, %arg3: memref<8x1xf32, #tpu.memory_space<vmem>>, %arg4: memref<1x8x324xf32, #tpu.memory_space<vmem>>) attributes {dimension_semantics = [#tpu.dimension_semantics<parallel>], iteration_bounds = array<i64: 2>, scalar_prefetch = 0 : i64, scratch_operands = 0 : i64, tpu.core_type = #tpu.core_type<tc>, window_params = [{transform_indices = @transform_0, window_bounds = array<i64: 1, 8, 362>}, {pipeline_mode = #tpu.pipeline_mode<synchronous>, transform_indices = @transform_1, window_bounds = array<i64: 8, 72>}, {pipeline_mode = #tpu.pipeline_mode<synchronous>, transform_indices = @transform_2, window_bounds = array<i64: 8, 1>}, {transform_indices = @transform_3, window_bounds = array<i64: 1, 8, 324>}]} {
    %c0 = arith.constant 0 : index
    %c0_0 = arith.constant 0 : index
    %0 = vector.load %arg2[%c0, %c0_0] : memref<8x72xf32, #tpu.memory_space<vmem>>, vector<8x72xf32>
    %c0_1 = arith.constant 0 : index
    %c0_2 = arith.constant 0 : index
    %1 = vector.load %arg3[%c0_1, %c0_2] : memref<8x1xf32, #tpu.memory_space<vmem>>, vector<8x1xf32>
    %2 = vector.shape_cast %1 : vector<8x1xf32> to vector<8x1xf32>
    %3 = vector.broadcast %2 : vector<8x1xf32> to vector<8x324xf32>
    %c0_3 = arith.constant 0 : index
    %c0_4 = arith.constant 0 : index
    %c0_5 = arith.constant 0 : index
    %4 = vector.load %arg1[%c0_3, %c0_4, %c0_5] : memref<1x8x362xf32, #tpu.memory_space<vmem>>, vector<1x8x362xf32>
    %5 = vector.shape_cast %4 : vector<1x8x362xf32> to vector<8x362xf32>
    %6 = vector.extract_strided_slice %5 {offsets = [0, 0], sizes = [8, 324], strides = [1, 1]} : vector<8x362xf32> to vector<8x324xf32>
    %7 = vector.extract_strided_slice %5 {offsets = [0, 1], sizes = [8, 324], strides = [1, 1]} : vector<8x362xf32> to vector<8x324xf32>
    %8 = vector.extract_strided_slice %5 {offsets = [0, 2], sizes = [8, 324], strides = [1, 1]} : vector<8x362xf32> to vector<8x324xf32>
    %9 = vector.extract_strided_slice %5 {offsets = [0, 18], sizes = [8, 324], strides = [1, 1]} : vector<8x362xf32> to vector<8x324xf32>
    %10 = vector.extract_strided_slice %5 {offsets = [0, 19], sizes = [8, 324], strides = [1, 1]} : vector<8x362xf32> to vector<8x324xf32>
    %11 = vector.extract_strided_slice %5 {offsets = [0, 20], sizes = [8, 324], strides = [1, 1]} : vector<8x362xf32> to vector<8x324xf32>
    %12 = vector.extract_strided_slice %5 {offsets = [0, 36], sizes = [8, 324], strides = [1, 1]} : vector<8x362xf32> to vector<8x324xf32>
    %13 = vector.extract_strided_slice %5 {offsets = [0, 37], sizes = [8, 324], strides = [1, 1]} : vector<8x362xf32> to vector<8x324xf32>
    %14 = vector.extract_strided_slice %5 {offsets = [0, 38], sizes = [8, 324], strides = [1, 1]} : vector<8x362xf32> to vector<8x324xf32>
    %15 = tpu.concatenate %6, %7, %8, %9, %10, %11, %12, %13, %14 in 0 : vector<8x324xf32>, vector<8x324xf32>, vector<8x324xf32>, vector<8x324xf32>, vector<8x324xf32>, vector<8x324xf32>, vector<8x324xf32>, vector<8x324xf32>, vector<8x324xf32> -> vector<72x324xf32>
    %cst = arith.constant dense<0.000000e+00> : vector<8x324xf32>
    %16 = tpu.matmul %0, %15, %cst {dimension_numbers = #tpu.dot_dimension_numbers<[1], [0], [0], [1], [0, 0, 1, 1], [], []>} : vector<8x72xf32>, vector<72x324xf32>, vector<8x324xf32> -> vector<8x324xf32>
    %17 = arith.addf %16, %3 : vector<8x324xf32>
    %c0_6 = arith.constant 0 : index
    %c0_7 = arith.constant 0 : index
    %c0_8 = arith.constant 0 : index
    %18 = vector.load %arg4[%c0_6, %c0_7, %c0_8] : memref<1x8x324xf32, #tpu.memory_space<vmem>>, vector<1x8x324xf32>
    %19 = vector.shape_cast %18 : vector<1x8x324xf32> to vector<8x324xf32>
    %20 = vector.shape_cast %17 : vector<8x324xf32> to vector<1x8x324xf32>
    tpu.vector_store %arg4[%c0_6, %c0_7, %c0_8], %20 {strides = array<i32>} : memref<1x8x324xf32, #tpu.memory_space<vmem>>, vector<1x8x324xf32>,
    return
  }
  func.func @transform_0(%arg0: i32) -> (i32, i32, i32) {
    %c0_i32 = arith.constant 0 : i32
    %c0_i32_0 = arith.constant 0 : i32
    %c0_i32_1 = arith.constant 0 : i32
    return %arg0, %c0_i32, %c0_i32_0 : i32, i32, i32
  }
  func.func @transform_1(%arg0: i32) -> (i32, i32) {
    %c0_i32 = arith.constant 0 : i32
    %c0_i32_0 = arith.constant 0 : i32
    %c0_i32_1 = arith.constant 0 : i32
    return %c0_i32, %c0_i32_0 : i32, i32
  }
  func.func @transform_2(%arg0: i32) -> (i32, i32) {
    %c0_i32 = arith.constant 0 : i32
    %c0_i32_0 = arith.constant 0 : i32
    %c0_i32_1 = arith.constant 0 : i32
    return %c0_i32, %c0_i32_0 : i32, i32
  }
  func.func @transform_3(%arg0: i32) -> (i32, i32, i32) {
    %c0_i32 = arith.constant 0 : i32
    %c0_i32_0 = arith.constant 0 : i32
    %c0_i32_1 = arith.constant 0 : i32
    return %arg0, %c0_i32, %c0_i32_0 : i32, i32, i32
  }
}

</mosaic_0001>

<bundles_post_ra>
// kernel: tpu_custom_call.1
= control target key start
LH: loop header
LB: loop body
LE: loop exit
PB: predicated region body
PF: predicated region fallthrough
CT: control target
= control target key end

     0   :  { %8 = vsyncpa [#allocation3], 0  ;;  %s838_s0 = inlined_call_operand.hbm [shape: f32[2,8,362], index: 0, kind: input, shape index: {}]   ;;  %s839_s1 = inlined_call_operand.vmem [shape: f32[8,72], index: 1, kind: input, shape index: {}]   ;;  %s840_s2 = inlined_call_operand.vmem [shape: f32[8,1], index: 2, kind: input, shape index: {}]   ;;  %s841_s3 = inlined_call_operand.hbm [shape: f32[2,8,324], index: 3, kind: output, shape index: {}]  }
   0x1   :  { %10 = vsyncpa [#allocation3 + $0x1], 0 }
   0x2   :  { %11 = vsyncpa [#allocation4], 0 }
   0x3   :  { %13 = vsyncpa [#allocation4 + $0x1], 0  ;;  %s692_s12 = smov 0   ;;  %s694_s13 = smov 0  }
   0x4   :  { %s696_s14 = smov 0   ;;  %s698_s15 = smov 0  }
   0x5 LB: > { %s713_s16 = sadd.s32 4294967295, %s661_s15   ;;  %s453_s17 = sadd.s32 4294967294, %s661_s15   ;;  %s661_s15 = sphi %s698_s15, %s849_s15   ;;  %s657_s14 = sphi %s696_s14, %s848_s14   ;;  %s653_s13 = sphi %s694_s13, %s847_s13   ;;  %s649_s12 = sphi %s692_s12, %s846_s12  }
   0x6   : > { %s717_s18 = sadd.s32 1, %s661_s15   ;;  %s26_s19 = sadd.s32 1, %s657_s14 }
   0x7   : > { %s23_s20 = ssub.s32 %s661_s15, %s717_s18  ;;  %p33_p0 = scmp.ne.s32.totalorder %s657_s14, %s653_s13 }
   0x8   : > { %p24_p1 = scmp.eq.s32.totalorder %s23_s20, 0  ;;  %p34_p2 = scmp.eq.s32.totalorder %s661_s15, 0 }
   0x9   : > { %p39_p3 = scmp.ne.s32.totalorder %s653_s13, %s649_s12  ;;  %p40_p4 = scmp.eq.s32.totalorder %s713_s16, 0 }
   0xa   : > { %s729_s21 = scalar_select %p24_p1, %s657_s14, %s26_s19  }
   0xb   : > { %p35_p5 = por %p34_p2, %p33_p0  ;;  %p731_p6 = por %p40_p4, %p39_p3 }
   0xc   : > { %p105_p7 = scmp.eq.s32.totalorder %s713_s16, 1  ;;  %p111_p8 = scmp.eq.s32.totalorder %s453_s17, 1 }
   0xd   : > { %p455_p9 = scmp.ge.s32.totalorder %s661_s15, 2  ;;  %p480_p10 = scmp.lt.s32.totalorder %s661_s15, 2 }
   0xe   : > { %p738_p11 = por %p105_p7, %p33_p0  ;;  %p742_p12 = por %p111_p8, %p39_p3 }
   0xf   : > { %s137_s25 = sand.u32 1, %s657_s14   ;;  %s465_s26 = smul.u32 24, %s661_s15 }
  0x10   : > { %s464_s27 = smul.u32 24, %s137_s25  ;;  %p751_p13 = pnand %p480_p10, %p35_p5 }
  0x11   : > { %s146_s30 = scalar_lea.hbm %s838_s0, %s465_s26  ;;  %s138_s8 = scalar_lea.sflag [#allocation3], %s137_s25 }
  0x12   : > { %s148_s5 = sshll.u32 %s146_s30, 4  ;;  %s141_s6 = scalar_lea.vmem [#allocation2], %s464_s27  ;;  %s149_s5 = int_to_ptr.hbm [resolvable:$true] %s148_s5 }
  0x13   : > { %s150_s7 = sshll.u32 %s141_s6, 4  ;;  %s565_s9 = sshra.s32 %s149_s5, 4  ;;  %s151_s7 = int_to_ptr.vmem [resolvable:$true] %s150_s7  ;;  %s566_s9 = int_to_ptr.hbm [resolvable:$true] %s565_s9 }
  0x14   : > { %s567_s10 = scalar_lea.hbm %s566_s9, 24  ;;  %p569_p1 = pneg %p751_p13 }
  0x15   : > { %p568_p0 = scmp.ne.s32.totalorder %s566_s9, %s567_s10  ;;  %s572_s19 = scalar_lea.hbm %s838_s0, 48 }
  0x16   : > { %p573_p4 = scmp.lt.s32.totalorder %s566_s9, %s838_s0  ;;  %p574_p5 = scmp.lt.s32.totalorder %s572_s19, %s567_s10 }
  0x17   : > { %p570_p2 = pnand %p569_p1, %p568_p0 }
  0x18   : > { %p575_p7 = por %p574_p5, %p573_p4 }
  0x19   : > { %p571_p3 = pneg %p570_p2 }
  0x1b   : > { %p576_p8 = pnand %p575_p7, %p571_p3 }
  0x1d   : > { %579 = shalt.err (!%p576_p8)
}
  0x1e   : > { %475 = dma.hbm_to_vmem [thread:$0]  (!%p751_p13), %s149_s5, 384, %s151_s7, %s138_s8  }
  0x1f   : > { %p457_p10 = scmp.ge.s32.totalorder %s661_s15, 1  ;;  %p155_p0 = scmp.lt.s32.totalorder %s661_s15, 3 }
  0x21   : > { %p156_p1 = pnand %p457_p10, %p155_p0 }
  0x22   : > { %s768_s25 = sand.u32 (!%p156_p1), 1, %s653_s13  }
  0x23   : > { %159 = sbr.rel (%p156_p1) target bundleno = 335 (0x14f), region = 32  ;;  %s162_s28 = scalar_lea.sflag (!%p156_p1), [#allocation3], %s768_s25 }
  0x24   : > { %s466_s27 = smul.u32 (!%p156_p1), 24, %s768_s25 }
  0x26   : > { %s165_s29 = scalar_lea.vmem (!%p156_p1), [#allocation2], %s466_s27 }
  0x28   : > { %640 = dma.done.wait (%p731_p6), %s162_s28, 384  }
  0x29   : > { %642 = vsyncadd (%p731_p6), %s162_s28, 4294966912  ;;  %v778_v0 = vld [vmem:[%s165_s29] sm:$0xff]  ;;  %v780_v1 = vld [vmem:[%s165_s29 + $0x10] sm:$0xff]  ;;  %s663_s30 = smov 92   ;;  %s664_s4 = smov 90   ;;  %vm292_vm0 = vcmask 736256  }
  0x2a   : > { %v533_v2 = vpack.i.bf16 %v778_v0, %v780_v1  ;;  %s665_s5 = smov 108   ;;  %v784_v3 = vld [vmem:[%s165_s29 + $0x8] sm:$0xff]  ;;  %s666_s6 = smov 91   ;;  %vm280_vm1 = vcmask 744448   ;;  %vm268_vm2 = vcmask 752640   ;;  %v671_v22 = vmov 0  }
  0x2b   : > { %s667_s22 = smov 109   ;;  %s668_s7 = smov 110   ;;  %v190_v21 = vld [vmem:[%s840_s2] sm:$0xff]  ;;  %563 = vset.pattern.permute.xlu1 %v671_v22  ;;  %564 = vset.pattern.permute.xlu0 %v671_v22  ;;  %vm256_vm3 = vcmask 883712   ;;  %vm244_vm4 = vcmask 891904   ;;  %vm232_vm5 = vcmask 900096  }
  0x2c   : > { %534 = vrot.lane.b32.xlu1 %v533_v2, %s663_s30  ;;  %524 = vrot.lane.b32.xlu0 %v533_v2, %s664_s4  ;;  %s669_s8 = smov 126   ;;  %s670_s9 = smov 127   ;;  %vm220_vm6 = vcmask 1031168   ;;  %v189_v50 = vld [vmem:[%s839_s1] sm:$0xff]  ;;  %vm298_vm7 = vcmask 588800   ;;  %vm208_vm8 = vcmask 1039360  }
  0x2d   : > { %539 = vrot.lane.b32.xlu2 %v533_v2, %s665_s5  ;;  %s467_s20 = smul.u32 24, %s713_s16  ;;  %vm364_vm9 = vcmask 556032   ;;  %s367_s16 = scalar_lea.sflag [#allocation4], %s768_s25 }
  0x2f   : > { %s378_s29 = scalar_lea.hbm %s841_s3, %s467_s20 }
  0x34   : > { %288 = vrot.lane.b32.xlu1 %v784_v3, %s664_s4  ;;  %529 = vrot.lane.b32.xlu0 %v533_v2, %s666_s6 }
  0x35   : > { %276 = vrot.lane.b32.xlu2 %v784_v3, %s666_s6 }
  0x3c   : > { %264 = vrot.lane.b32.xlu1 %v784_v3, %s663_s30  ;;  %544 = vrot.lane.b32.xlu0 %v533_v2, %s667_s22  ;;  %s188_s30 = scalar_lea.vmem [#allocation5], %s466_s27 }
  0x3d   : > { %549 = vrot.lane.b32.xlu2 %v533_v2, %s668_s7  ;;  %s380_s4 = sshll.u32 %s188_s30, 4  ;;  %s381_s4 = int_to_ptr.vmem [resolvable:$true] %s380_s4 }
  0x44   : > { %554 = vrot.lane.b32.xlu1 %v533_v2, %s669_s8  ;;  %252 = vrot.lane.b32.xlu0 %v784_v3, %s665_s5  ;;  %s382_s5 = sshll.u32 %s378_s29, 4  ;;  %s383_s5 = int_to_ptr.hbm [resolvable:$true] %s382_s5 }
  0x45   : > { %240 = vrot.lane.b32.xlu2 %v784_v3, %s667_s22  ;;  %s609_s6 = sshra.s32 %s383_s5, 4  ;;  %s610_s6 = int_to_ptr.hbm [resolvable:$true] %s609_s6 }
  0x46   : > { %s611_s22 = scalar_lea.hbm %s610_s6, 24  ;;  %p616_p3 = scmp.lt.s32.totalorder %s610_s6, %s841_s3 }
  0x47   : > { %p612_p6 = scmp.ne.s32.totalorder %s610_s6, %s611_s22 }
  0x49   : > { %p613_p13 = pnand %p612_p6, %p738_p11 }
  0x4b   : > { %p614_p2 = pneg %p613_p13 }
  0x4c   : > { %228 = vrot.lane.b32.xlu1 %v784_v3, %s668_s7  ;;  %559 = vrot.lane.b32.xlu0 %v533_v2, %s670_s9 }
  0x4d   : > { %216 = vrot.lane.b32.xlu2 %v784_v3, %s669_s8  ;;  %s615_s8 = scalar_lea.hbm %s841_s3, 48 }
  0x4e   : > { %p617_p4 = scmp.lt.s32.totalorder %s615_s8, %s611_s22 }
  0x50   : > { %p618_p5 = por %p617_p4, %p616_p3 }
  0x52   : > { %p619_p7 = pnand %p618_p5, %p614_p2 }
  0x54   : > { %204 = vrot.lane.b32.xlu0 %v784_v3, %s670_s9  ;;  %193 = vperm.xlu1 %563, %v190_v21  }
  0x87   : > { %v540_v4 = vpop.permute.xlu2 %539 }
  0x88   : > { %v541_v20 = vunpack.i.l.bf16 %v540_v4  ;;  %v542_v30 = vunpack.i.h.bf16 %v540_v4 }
  0x8f   : > { %v277_v8 = vpop.permute.xlu2 %276 }
  0x97   : > { %v550_v19 = vpop.permute.xlu2 %549 }
  0x98   : > { %v551_v29 = vunpack.i.l.bf16 %v550_v19  ;;  %v552_v40 = vunpack.i.h.bf16 %v550_v19 }
  0x9e   : > { %v535_v5 = vpop.permute.xlu1 %534  ;;  %v525_v6 = vpop.permute.xlu0 %524 }
  0x9f   : > { %v526_v7 = vunpack.i.l.bf16 %v525_v6  ;;  %v527_v9 = vunpack.i.h.bf16 %v525_v6  ;;  %v536_v18 = vunpack.i.l.bf16 %v535_v5  ;;  %v537_v23 = vunpack.i.h.bf16 %v535_v5  ;;  %v241_v32 = vpop.permute.xlu2 %240 }
  0xa1   : > { %349 = vmatpush.msra.mxu2 %v526_v7 }
  0xa6   : > { %v289_v10 = vpop.permute.xlu1 %288  ;;  %v530_v11 = vpop.permute.xlu0 %529 }
  0xa7   : > { %v532_v12 = vunpack.i.h.bf16 %v530_v11  ;;  %v293_v13 = vsel %vm292_vm0, %v527_v9, %v289_v10  ;;  %v294_v14 = vsel %vm292_vm0, %v289_v10, %v526_v7  ;;  %v531_v15 = vunpack.i.l.bf16 %v530_v11  ;;  %v217_v42 = vpop.permute.xlu2 %216 }
  0xa8   : > { %309 = vmatpush.msra.mxu0 %v293_v13  ;;  %329 = vmatpush.msra.mxu1 %v294_v14 }
  0xa9   : > { %350 = vmatpush.msra.mxu2 %v531_v15  ;;  %v281_v16 = vsel %vm280_vm1, %v532_v12, %v277_v8  ;;  %v282_v17 = vsel %vm280_vm1, %v277_v8, %v531_v15 }
  0xaa   : > { %310 = vmatpush.msra.mxu0 %v281_v16  ;;  %330 = vmatpush.msra.mxu1 %v282_v17 }
  0xab   : > { %351 = vmatpush.msra.mxu2 %v536_v18 }
  0xad   : > { %352 = vmatpush.msra.mxu2 %v541_v20 }
  0xae   : > { %v265_v24 = vpop.permute.xlu1 %264  ;;  %v545_v25 = vpop.permute.xlu0 %544 }
  0xaf   : > { %v269_v26 = vsel %vm268_vm2, %v537_v23, %v265_v24  ;;  %v270_v27 = vsel %vm268_vm2, %v265_v24, %v536_v18  ;;  %v546_v28 = vunpack.i.l.bf16 %v545_v25  ;;  %v547_v31 = vunpack.i.h.bf16 %v545_v25 }
  0xb0   : > { %311 = vmatpush.msra.mxu0 %v269_v26  ;;  %331 = vmatpush.msra.mxu1 %v270_v27 }
  0xb1   : > { %353 = vmatpush.msra.mxu2 %v546_v28  ;;  %v245_v38 = vsel %vm244_vm4, %v547_v31, %v241_v32  ;;  %v246_v39 = vsel %vm244_vm4, %v241_v32, %v546_v28 }
  0xb3   : > { %354 = vmatpush.msra.mxu2 %v551_v29 }
  0xb6   : > { %v555_v33 = vpop.permute.xlu1 %554  ;;  %v253_v34 = vpop.permute.xlu0 %252 }
  0xb7   : > { %v257_v35 = vsel %vm256_vm3, %v542_v30, %v253_v34  ;;  %v258_v36 = vsel %vm256_vm3, %v253_v34, %v541_v20  ;;  %v556_v37 = vunpack.i.l.bf16 %v555_v33  ;;  %v557_v41 = vunpack.i.h.bf16 %v555_v33 }
  0xb8   : > { %312 = vmatpush.msra.mxu0 %v257_v35  ;;  %332 = vmatpush.msra.mxu1 %v258_v36 }
  0xb9   : > { %355 = vmatpush.msra.mxu2 %v556_v37  ;;  %v221_v48 = vsel %vm220_vm6, %v557_v41, %v217_v42  ;;  %v222_v49 = vsel %vm220_vm6, %v217_v42, %v556_v37 }
  0xba   : > { %313 = vmatpush.msra.mxu0 %v245_v38  ;;  %333 = vmatpush.msra.mxu1 %v246_v39 }
  0xbe   : > { %v229_v43 = vpop.permute.xlu1 %228  ;;  %v560_v44 = vpop.permute.xlu0 %559 }
  0xbf   : > { %v233_v45 = vsel %vm232_vm5, %v552_v40, %v229_v43  ;;  %v234_v46 = vsel %vm232_vm5, %v229_v43, %v551_v29  ;;  %v561_v47 = vunpack.i.l.bf16 %v560_v44  ;;  %v562_v51 = vunpack.i.h.bf16 %v560_v44 }
  0xc0   : > { %314 = vmatpush.msra.mxu0 %v233_v45  ;;  %334 = vmatpush.msra.mxu1 %v234_v46 }
  0xc1   : > { %356 = vmatpush.msra.mxu2 %v561_v47 }
  0xc2   : > { %315 = vmatpush.msra.mxu0 %v221_v48  ;;  %335 = vmatpush.msra.mxu1 %v222_v49 }
  0xc3   : > { %357 = vmatpush.msra.mxu2 %v780_v1 }
  0xc4   : > { %460 = vmatmul.msk.f32.vlgmr.msra.gmra.mxu2 %vm298_vm7, %v189_v50 }
  0xc6   : > { %v205_v52 = vpop.permute.xlu0 %204  ;;  %v194_v55 = vpop.permute.xlu1 %193 }
  0xc7   : > { %v209_v53 = vsel %vm208_vm8, %v562_v51, %v205_v52  ;;  %v210_v54 = vsel %vm208_vm8, %v205_v52, %v561_v47 }
  0xc8   : > { %316 = vmatpush.msra.mxu0 %v209_v53  ;;  %336 = vmatpush.msra.mxu1 %v210_v54 }
  0xca   : > { %317 = vmatpush.msra.mxu0 %v778_v0  ;;  %337 = vmatpush.msra.mxu1 %v784_v3 }
  0xcb   : > { %458 = vmatmul.msk.f32.vlgmr.msra.gmra.mxu0 %vm298_vm7, %v189_v50  ;;  %459 = vmatmul.msk.f32.vlgmr.msra.gmra.mxu1 %vm298_vm7, %v189_v50 }
 0x147   : > { %v359_v56 = vpop.f32.mrf.mxu2 }
 0x148   : > { %v319_v57 = vpop.f32.mrf.mxu0  ;;  %v339_v58 = vpop.f32.mrf.mxu1  ;;  %v360_v59 = vadd.f32 %v359_v56, %v194_v55 }
 0x149   : > { %v320_v60 = vadd.f32 %v319_v57, %v194_v55  ;;  %v340_v61 = vadd.f32 %v339_v58, %v194_v55 }
 0x14a   : > { %365 = vst.msk [vmem:[%s188_s30 + $0x10] sm:$0xff] %vm364_vm9, %v360_v59 }
 0x14b   : > { %362 = vst [vmem:[%s188_s30] sm:$0xff] %v320_v60 }
 0x14c   : > { %363 = vst [vmem:[%s188_s30 + $0x8] sm:$0xff] %v340_v61 }
 0x14d   : > { %622 = shalt.err (!%p619_p7)
}
 0x14e   : > { %470 = dma.vmem_to_hbm [thread:$0]  (%p738_p11), %s381_s4, 384, %s383_s5, %s367_s16  }
 0x14f PF: > { %s394_s25 = sand.u32 1, %s649_s12   ;;  %p477_p8 = pnand %p455_p9, %p742_p12 }
 0x150   : > { %s395_s11 = scalar_lea.sflag [#allocation4], %s394_s25 }
 0x151   : > { %p478_p10 = pneg %p477_p8 }
 0x153   : > { %644 = dma.done.wait (%p478_p10), %s395_s11, 384  }
 0x154   : > { %646 = vsyncadd (%p478_p10), %s395_s11, 4294966912  ;;  %p16_p0 = scmp.ge.s32.totalorder %s717_s18, 4   ;;  %s846_s12 = smov %s653_s13 }
 0x155   : > { %s847_s13 = smov %s657_s14  ;;  %s848_s14 = smov %s729_s21 }
 0x156   : > { %s849_s15 = smov %s717_s18  ;;  %18 = sbr.rel (!%p16_p0) target bundleno = 5 (0x5), region = 77 }
 0x15b   :  { %401 = vsyncpa [#allocation3], 1 }
 0x15c   :  { %403 = vsyncpa [#allocation3 + $0x1], 1 }
 0x15d   :  { %404 = vsyncpa [#allocation4], 1 }
 0x15e   :  { %406 = vsyncpa [#allocation4 + $0x1], 1 }

</bundles_post_ra>
